<compile_context>
chip_gen: v7x
topology: tpu7x:2x2x1
jax: 0.10.0
libtpu: 0.0.40
codegen_flags: <defaults>
</compile_context>

<pallas_src>
import functools
import math

import jax
import jax.numpy as jnp
from jax.experimental import pallas as pl
from jax.experimental.pallas import tpu as pltpu

_SUBLANES = 8

# Upper bounds for the tiled A propagation tiles (actual tiles are adaptive).
_TM_MAX = 1024
_TK_MAX = 2048
_TILE_MIN = 512


def _round_up(x, m):
    return ((x + m - 1) // m) * m


@functools.lru_cache(maxsize=None)
def _vmem_capacity_bytes():
    """Physical per-core VMEM; conservative fallback if the query fails."""
    try:
        return int(pltpu.get_tpu_info().vmem_capacity_bytes)
    except Exception:  # pragma: no cover
        return 64 * 1024 * 1024  # v7x-sized fallback, safe everywhere


def _vmem_limit_bytes():
    # ~75% of physical VMEM: ~96 MiB on v5e/v6e (128 MiB), ~48 MiB on v7x (64).
    cap = _vmem_capacity_bytes()
    return int(min(max(cap * 3 // 4, 32 * 1024 * 1024), 112 * 1024 * 1024))


def _fused_conv_max_nodes():
    # The grid-less fused conv stack keeps the whole bf16 (A+I) in VMEM; keep it
    # at <= 1/3 of the scoped limit as headroom for temporaries/other operands.
    # TODO(synk): on v7x the grid-less fused kernel runs on one TensorCore only;
    #             the fused/tiled crossover could be lowered there after profiling.
    budget = _vmem_limit_bytes() // 3
    n = int(math.isqrt(budget // 2))
    return max(128, (n // _SUBLANES) * _SUBLANES)


def _pick_tile(n, max_tile):
    """Largest power-of-two tile <= max_tile whose padding waste is <~12.5%."""
    t = max_tile
    while t > _TILE_MIN and (_round_up(n, t) - n) * 8 > n:
        t //= 2
    return t


# ----------------------------------------------------------------------------
# Pallas kernels
# ----------------------------------------------------------------------------
def _propagate_kernel(a_ref, h_ref, dcol_ref, drow_ref, w_ref, b_ref,
                      o_ref, acc_ref, *, tk):
    k = pl.program_id(1)

    @pl.when(k == 0)
    def _init():
        acc_ref[...] = jnp.zeros_like(acc_ref)

    # Fused feature transform: (tk, F_in) slice of resident h, column-scaled by
    # d_inv_sqrt, pushed through W. Tiny vs the A matmul; hides under the A DMA.
    start = pl.multiple_of(k * tk, tk)
    h_k = (h_ref[pl.ds(start, tk), :].astype(jnp.float32)
           * dcol_ref[pl.ds(start, tk), :])
    xw_k = jnp.dot(h_k, w_ref[...],
                   preferred_element_type=jnp.float32).astype(jnp.bfloat16)
    acc_ref[...] += jnp.dot(a_ref[...], xw_k, preferred_element_type=jnp.float32)

    @pl.when(k == pl.num_programs(1) - 1)
    def _finalize():
        # Row scale + bias + tanh only once per output tile.
        o_ref[...] = jnp.tanh(
            drow_ref[...] * acc_ref[...] + b_ref[...]).astype(o_ref.dtype)


def propagate_tanh(a, h, d_col, d_row, w, b, *, tm, tk):
    """bf16 tanh(d_row * ((A+I) @ (d_col * h) @ W) + b), tiled over (rows, K)."""
    n_rows, n_cols = a.shape
    f_in = h.shape[1]
    f_out = w.shape[1]
    grid = (n_rows // tm, n_cols // tk)
    cost = pl.CostEstimate(
        flops=2 * n_rows * n_cols * f_out + 2 * grid[0] * n_cols * f_in * f_out,
        transcendentals=n_rows * f_out,
        bytes_accessed=(n_rows * n_cols * 2 + n_cols * f_in * 2
                        + n_rows * f_out * 2 + n_cols * 4 + n_rows * 4
                        + f_in * f_out * 4 + f_out * 4),
    )
    return pl.pallas_call(
        functools.partial(_propagate_kernel, tk=tk),
        out_shape=jax.ShapeDtypeStruct((n_rows, f_out), jnp.bfloat16),
        grid=grid,
        in_specs=[
            pl.BlockSpec((tm, tk), lambda i, k: (i, k)),        # A tile (dominant)
            pl.BlockSpec((n_cols, f_in), lambda i, k: (0, 0)),  # h resident
            pl.BlockSpec((n_cols, 1), lambda i, k: (0, 0)),     # d_col resident
            pl.BlockSpec((tm, 1), lambda i, k: (i, 0)),         # d_row row tile
            pl.BlockSpec((f_in, f_out), lambda i, k: (0, 0)),   # W resident
            pl.BlockSpec((1, f_out), lambda i, k: (0, 0)),      # bias resident
        ],
        out_specs=pl.BlockSpec((tm, f_out), lambda i, k: (i, 0)),
        scratch_shapes=[pltpu.VMEM((tm, f_out), jnp.float32)],
        compiler_params=pltpu.CompilerParams(
            dimension_semantics=("parallel", "arbitrary"),
            vmem_limit_bytes=_vmem_limit_bytes(),
        ),
        cost_estimate=cost,
    )(a, h, d_col, d_row, w, b)


def _fused_conv_stack_kernel(a_ref, d_ref, x_ref, w1, b1, w2, b2, w3, b3, o_ref):
    # conv1 -> conv2 -> conv3 with (A + I) read from HBM once; the symmetric
    # D^{-1/2} normalization is folded in via the resident d vector.
    a = a_ref[...]
    d = d_ref[...]                          # (n, 1) f32
    h = x_ref[...].astype(jnp.float32)
    for w_ref, b_ref in ((w1, b1), (w2, b2), (w3, b3)):
        xw = jnp.dot(d * h, w_ref[...],
                     preferred_element_type=jnp.float32).astype(a.dtype)
        h = jnp.tanh(d * jnp.dot(a, xw, preferred_element_type=jnp.float32)
                     + b_ref[...])
    o_ref[...] = h.astype(o_ref.dtype)


def fused_conv_stack(a, d, x, params):
    """Single-kernel 3-layer GCN conv stack for graphs whose (A+I) fits VMEM."""
    n = x.shape[0]
    c = params["conv1_w"].shape[1]
    operands = (
        a, d, x,
        params["conv1_w"], params["conv1_b"],
        params["conv2_w"], params["conv2_b"],
        params["conv3_w"], params["conv3_b"],
    )
    spec2d = lambda s: pl.BlockSpec(s, lambda: (0, 0))
    return pl.pallas_call(
        _fused_conv_stack_kernel,
        out_shape=jax.ShapeDtypeStruct((n, c), jnp.bfloat16),
        in_specs=[spec2d(op.shape) for op in operands],
        out_specs=spec2d((n, c)),
        compiler_params=pltpu.CompilerParams(
            vmem_limit_bytes=_vmem_limit_bytes()),
    )(*operands)


def _pool_mlp_head_kernel(p_ref, h_ref, w1, b1, w2, b2, w3, b3, wo, bo, o_ref):
    # global_mean_pool as a matmul, then the 4-layer MLP head, all in VMEM so
    # the lane-sparse (G,32)/(G,1) intermediates never round-trip HBM.
    g = jnp.dot(p_ref[...], h_ref[...], preferred_element_type=jnp.float32)
    g = jnp.tanh(jnp.dot(g, w1[...], preferred_element_type=jnp.float32) + b1[...])
    g = jnp.tanh(jnp.dot(g, w2[...], preferred_element_type=jnp.float32) + b2[...])
    g = jnp.tanh(jnp.dot(g, w3[...], preferred_element_type=jnp.float32) + b3[...])
    o_ref[...] = (
        jnp.dot(g, wo[...], preferred_element_type=jnp.float32) + bo[...]
    ).astype(o_ref.dtype)


def pool_mlp_head(pool_mat, h, params):
    g = pool_mat.shape[0]
    operands = (
        pool_mat, h,
        params["lin1_w"], params["lin1_b"],
        params["lin2_w"], params["lin2_b"],
        params["lin3_w"], params["lin3_b"],
        params["out_w"], params["out_b"],
    )
    spec2d = lambda s: pl.BlockSpec(s, lambda: (0, 0))
    # TODO(synk): for very large N the (G, N) pooling matmul should itself be
    #             row-tiled with an accumulator; fine at these sizes.
    return pl.pallas_call(
        _pool_mlp_head_kernel,
        out_shape=jax.ShapeDtypeStruct((g, 1), jnp.float32),
        in_specs=[spec2d(op.shape) for op in operands],
        out_specs=spec2d((g, 1)),
        compiler_params=pltpu.CompilerParams(
            vmem_limit_bytes=_vmem_limit_bytes()),
    )(*operands)


# ----------------------------------------------------------------------------
# Plain-JAX glue (adjacency scatter / pooling matrix / parameters)
# ----------------------------------------------------------------------------
def build_raw_adj(edge_index, edge_weight, num_nodes):
    """Dense bf16 (A + I) plus f32 d_inv_sqrt (degrees via an O(E) segment sum).

    The D^{-1/2} row/col scaling itself is applied inside the Pallas kernels.
    PyG gcn_norm semantics: A[dst, src] += w; deg over incoming edges (dst).
    """
    loop = jnp.arange(num_nodes, dtype=edge_index.dtype)
    src = jnp.concatenate([edge_index[0], loop])
    dst = jnp.concatenate([edge_index[1], loop])
    w = jnp.concatenate([edge_weight.astype(jnp.float32),
                         jnp.ones((num_nodes,), jnp.float32)])
    a = jnp.zeros((num_nodes, num_nodes), jnp.float32).at[dst, src].add(w)
    deg = jax.ops.segment_sum(w, dst, num_segments=num_nodes)
    d_inv_sqrt = jnp.where(deg > 0, jax.lax.rsqrt(deg), 0.0).astype(jnp.float32)
    return a.astype(jnp.bfloat16), d_inv_sqrt


def build_pool_matrix(batch, num_graphs):
    """P (G, N): P[g, i] = 1/|graph g| if batch[i] == g, else 0."""
    one_hot = (batch[None, :] == jnp.arange(num_graphs)[:, None]).astype(jnp.float32)
    counts = jnp.maximum(one_hot.sum(axis=1, keepdims=True), 1.0)
    return one_hot / counts


def init_gcn_params(key, input_dim, conv_hidden, mlp_hidden):
    # NOTE: the PyTorch module declares lin2/lin3 as Linear(conv_hidden,
    # mlp_hidden); its forward only type-checks when conv_hidden == mlp_hidden.
    ks = jax.random.split(key, 14)

    def dense(k, fan_in, fan_out):
        scale = 1.0 / jnp.sqrt(jnp.float32(fan_in))
        return jax.random.uniform(k, (fan_in, fan_out), jnp.float32, -scale, scale)

    def bias(k, fan_in, fan_out):
        scale = 1.0 / jnp.sqrt(jnp.float32(fan_in))
        return jax.random.uniform(k, (1, fan_out), jnp.float32, -scale, scale)

    return {
        "conv1_w": dense(ks[0], input_dim, conv_hidden),
        "conv1_b": bias(ks[1], input_dim, conv_hidden),
        "conv2_w": dense(ks[2], conv_hidden, conv_hidden),
        "conv2_b": bias(ks[3], conv_hidden, conv_hidden),
        "conv3_w": dense(ks[4], conv_hidden, conv_hidden),
        "conv3_b": bias(ks[5], conv_hidden, conv_hidden),
        "lin1_w": dense(ks[6], conv_hidden, mlp_hidden),
        "lin1_b": bias(ks[7], conv_hidden, mlp_hidden),
        "lin2_w": dense(ks[8], conv_hidden, mlp_hidden),
        "lin2_b": bias(ks[9], conv_hidden, mlp_hidden),
        "lin3_w": dense(ks[10], conv_hidden, mlp_hidden),
        "lin3_b": bias(ks[11], conv_hidden, mlp_hidden),
        "out_w": dense(ks[12], mlp_hidden, 1),
        "out_b": bias(ks[13], mlp_hidden, 1),
    }


def _fit_rows(h, target_rows):
    rows = h.shape[0]
    if rows == target_rows:
        return h
    if rows > target_rows:
        return h[:target_rows]
    return jnp.pad(h, ((0, target_rows - rows), (0, 0)))


def gcn_forward(params, x, edge_index, edge_weight, batch, num_graphs,
                conv_path="auto"):
    num_nodes = x.shape[0]
    a_raw, d_inv_sqrt = build_raw_adj(edge_index, edge_weight, num_nodes)
    pool_mat = build_pool_matrix(batch, num_graphs)

    if conv_path == "auto":
        conv_path = "fused" if num_nodes <= _fused_conv_max_nodes() else "tiled"

    if conv_path == "fused":
        # (A + I) read from HBM once for all three conv layers.
        n_pad = _round_up(num_nodes, _SUBLANES)
        pad = n_pad - num_nodes
        a_p = jnp.pad(a_raw, ((0, pad), (0, pad)))
        d_p = jnp.pad(d_inv_sqrt, (0, pad)).reshape(n_pad, 1)
        x_p = jnp.pad(x, ((0, pad), (0, 0))).astype(jnp.bfloat16)
        h = fused_conv_stack(a_p, d_p, x_p, params)            # (n_pad, C) bf16
        h_rows = n_pad
    elif conv_path == "tiled":
        # Tiled contraction over (A+I) columns, f32 accumulator, finalize
        # epilogue; decoupled row/col padding and adaptive tiles.
        # TODO(synk): for genuinely sparse graphs, skip all-zero A tiles via a
        #             PrefetchScalarGridSpec block-sparse propagation.
        tm = _pick_tile(num_nodes, _TM_MAX)
        tk = _pick_tile(num_nodes, _TK_MAX)
        n_rows = _round_up(num_nodes, tm)
        n_cols = _round_up(num_nodes, tk)
        a_p = jnp.pad(a_raw, ((0, n_rows - num_nodes), (0, n_cols - num_nodes)))
        d_row = jnp.pad(d_inv_sqrt, (0, n_rows - num_nodes)).reshape(n_rows, 1)
        d_col = jnp.pad(d_inv_sqrt, (0, n_cols - num_nodes)).reshape(n_cols, 1)
        h = jnp.pad(x, ((0, n_cols - num_nodes), (0, 0))).astype(jnp.bfloat16)
        out = h
        for li, layer in enumerate(("conv1", "conv2", "conv3")):
            out = propagate_tanh(a_p, h, d_col, d_row,
                                 params[f"{layer}_w"], params[f"{layer}_b"],
                                 tm=tm, tk=tk)                 # (n_rows, C) bf16
            if li < 2:
                h = _fit_rows(out, n_cols)
        h = out
        h_rows = n_rows
    else:
        raise ValueError(f"unknown conv_path: {conv_path}")

    # F.dropout == identity (inference); pool + MLP head fused into one kernel.
    pool_p = jnp.pad(pool_mat,
                     ((0, 0), (0, h_rows - num_nodes))).astype(jnp.bfloat16)
    return pool_mlp_head(pool_p, h, params)                    # (num_graphs, 1)


def gcn_reference(params, x, edge_index, edge_weight, batch, num_graphs):
    """Plain-JAX reference mirroring the kernels' dtype choices (bf16 A / h)."""
    n = x.shape[0]
    a_bf16, d = build_raw_adj(edge_index, edge_weight, n)
    a = a_bf16.astype(jnp.float32)
    d = d[:, None]
    h = x.astype(jnp.bfloat16).astype(jnp.float32)
    for layer in ("conv1", "conv2", "conv3"):
        xw = jnp.dot(d * h, params[f"{layer}_w"]
                     ).astype(jnp.bfloat16).astype(jnp.float32)
        h = jnp.tanh(d * jnp.dot(a, xw) + params[f"{layer}_b"])
        h = h.astype(jnp.bfloat16).astype(jnp.float32)
    p = build_pool_matrix(batch, num_graphs).astype(jnp.bfloat16).astype(jnp.float32)
    g = jnp.dot(p, h)
    g = jnp.tanh(jnp.dot(g, params["lin1_w"]) + params["lin1_b"])
    g = jnp.tanh(jnp.dot(g, params["lin2_w"]) + params["lin2_b"])
    g = jnp.tanh(jnp.dot(g, params["lin3_w"]) + params["lin3_b"])
    return jnp.dot(g, params["out_w"]) + params["out_b"]


# ----------------------------------------------------------------------------
# Demo / self-check
# ----------------------------------------------------------------------------
if __name__ == "__main__":
    key = jax.random.PRNGKey(0)
    input_dim, conv_hidden, mlp_hidden = 8, 32, 32
    k_params, k_small, k_large = jax.random.split(key, 3)
    params = init_gcn_params(k_params, input_dim, conv_hidden, mlp_hidden)

    def make_graph_batch(k, num_nodes, num_graphs, num_edges):
        k_feat, k_src, k_off, k_w = jax.random.split(k, 4)
        x = jax.random.normal(k_feat, (num_nodes, input_dim), jnp.float32)
        src = jax.random.randint(k_src, (num_edges,), 0, num_nodes)
        off = jax.random.randint(k_off, (num_edges,), 1, num_nodes)
        dst = (src + off) % num_nodes  # no self loops in the raw edge list
        edge_index = jnp.stack([src, dst], axis=0).astype(jnp.int32)
        edge_weight = jax.random.uniform(k_w, (num_edges,), jnp.float32, 0.5, 1.5)
        batch = jnp.repeat(jnp.arange(num_graphs, dtype=jnp.int32),
                           num_nodes // num_graphs)
        return x, edge_index, edge_weight, batch

    fwd = jax.jit(gcn_forward, static_argnames=("num_graphs", "conv_path"))

    # 1) small batch (2 graphs x 8 nodes) -> fused conv-stack kernel.
    x, ei, ew, batch = make_graph_batch(k_small, 16, 2, 48)
    out_small = jax.block_until_ready(
        fwd(params, x, ei, ew, batch, num_graphs=2, conv_path="fused"))
    ref_small = gcn_reference(params, x, ei, ew, batch, 2)
    assert out_small.shape == (2, 1)
    assert jnp.allclose(out_small, ref_small, atol=5e-2, rtol=5e-2)

    # 2) larger batch forced onto the tiled grid + accumulator propagation path
    #    so both conv kernels are exercised regardless of TPU generation.
    x, ei, ew, batch = make_graph_batch(k_large, 1536, 3, 6000)
    out_large = jax.block_until_ready(
        fwd(params, x, ei, ew, batch, num_graphs=3, conv_path="tiled"))
    ref_large = gcn_reference(params, x, ei, ew, batch, 3)
    assert out_large.shape == (3, 1)
    assert jnp.allclose(out_large, ref_large, atol=5e-2, rtol=5e-2)

    # 3) auto path selection (generation-aware fused/tiled crossover).
    out_auto = jax.block_until_ready(
        fwd(params, x, ei, ew, batch, num_graphs=3, conv_path="auto"))
    assert jnp.allclose(out_auto, ref_large, atol=5e-2, rtol=5e-2)

    print("KERNEL_OK")
</pallas_src>

<mosaic_0001>
module attributes {stable_mosaic.version = 11 : i64} {
  func.func private @main(%arg0: i32) attributes {dimension_semantics = [#tpu.dimension_semantics<core_parallel>], iteration_bounds = array<i64: 2>, tpu.core_type = #tpu.core_type<sc_scalar_subcore>, window_params = []} {
    return
  }
}

module attributes {stable_mosaic.version = 11 : i64} {
  func.func private @main(%arg0: i32) attributes {dimension_semantics = [#tpu.dimension_semantics<core_parallel>], iteration_bounds = array<i64: 2>, tpu.core_type = #tpu.core_type<sc_scalar_subcore>, window_params = []} {
    return
  }
}

module attributes {stable_mosaic.version = 11 : i64} {
  func.func @_fused_conv_stack_kernel(%arg0: memref<16x16xbf16, #tpu.memory_space<vmem>>, %arg1: memref<16x1xf32, #tpu.memory_space<vmem>>, %arg2: memref<16x8xbf16, #tpu.memory_space<vmem>>, %arg3: memref<8x32xf32, #tpu.memory_space<vmem>>, %arg4: memref<1x32xf32, #tpu.memory_space<vmem>>, %arg5: memref<32x32xf32, #tpu.memory_space<vmem>>, %arg6: memref<1x32xf32, #tpu.memory_space<vmem>>, %arg7: memref<32x32xf32, #tpu.memory_space<vmem>>, %arg8: memref<1x32xf32, #tpu.memory_space<vmem>>, %arg9: memref<16x32xbf16, #tpu.memory_space<vmem>>) attributes {dimension_semantics = [], scalar_prefetch = 0 : i64, scratch_operands = 0 : i64, tpu.core_type = #tpu.core_type<tc>} {
    %c0 = arith.constant 0 : index
    %c0_0 = arith.constant 0 : index
    %0 = vector.load %arg0[%c0, %c0_0] : memref<16x16xbf16, #tpu.memory_space<vmem>>, vector<16x16xbf16>
    %c0_1 = arith.constant 0 : index
    %c0_2 = arith.constant 0 : index
    %1 = vector.load %arg1[%c0_1, %c0_2] : memref<16x1xf32, #tpu.memory_space<vmem>>, vector<16x1xf32>
    %c0_3 = arith.constant 0 : index
    %c0_4 = arith.constant 0 : index
    %2 = vector.load %arg2[%c0_3, %c0_4] : memref<16x8xbf16, #tpu.memory_space<vmem>>, vector<16x8xbf16>
    %3 = arith.extf %2 : vector<16x8xbf16> to vector<16x8xf32>
    %4 = vector.broadcast %1 : vector<16x1xf32> to vector<16x8xf32>
    %5 = arith.mulf %4, %3 : vector<16x8xf32>
    %c0_5 = arith.constant 0 : index
    %c0_6 = arith.constant 0 : index
    %6 = vector.load %arg3[%c0_5, %c0_6] : memref<8x32xf32, #tpu.memory_space<vmem>>, vector<8x32xf32>
    %cst = arith.constant dense<0.000000e+00> : vector<16x32xf32>
    %7 = tpu.matmul %5, %6, %cst {dimension_numbers = #tpu.dot_dimension_numbers<[1], [0], [0], [1], [0, 0, 1, 1], [], []>} : vector<16x8xf32>, vector<8x32xf32>, vector<16x32xf32> -> vector<16x32xf32>
    %8 = arith.truncf %7 : vector<16x32xf32> to vector<16x32xbf16>
    %cst_7 = arith.constant dense<0.000000e+00> : vector<16x32xf32>
    %9 = tpu.matmul %0, %8, %cst_7 {dimension_numbers = #tpu.dot_dimension_numbers<[1], [0], [0], [1], [0, 0, 1, 1], [], []>} : vector<16x16xbf16>, vector<16x32xbf16>, vector<16x32xf32> -> vector<16x32xf32>
    %10 = vector.broadcast %1 : vector<16x1xf32> to vector<16x32xf32>
    %11 = arith.mulf %10, %9 : vector<16x32xf32>
    %c0_8 = arith.constant 0 : index
    %c0_9 = arith.constant 0 : index
    %12 = vector.load %arg4[%c0_8, %c0_9] : memref<1x32xf32, #tpu.memory_space<vmem>>, vector<1x32xf32>
    %13 = vector.broadcast %12 : vector<1x32xf32> to vector<16x32xf32>
    %14 = arith.addf %11, %13 : vector<16x32xf32>
    %15 = math.tanh %14 : vector<16x32xf32>
    %16 = vector.broadcast %1 : vector<16x1xf32> to vector<16x32xf32>
    %17 = arith.mulf %16, %15 : vector<16x32xf32>
    %c0_10 = arith.constant 0 : index
    %c0_11 = arith.constant 0 : index
    %18 = vector.load %arg5[%c0_10, %c0_11] : memref<32x32xf32, #tpu.memory_space<vmem>>, vector<32x32xf32>
    %cst_12 = arith.constant dense<0.000000e+00> : vector<16x32xf32>
    %19 = tpu.matmul %17, %18, %cst_12 {dimension_numbers = #tpu.dot_dimension_numbers<[1], [0], [0], [1], [0, 0, 1, 1], [], []>} : vector<16x32xf32>, vector<32x32xf32>, vector<16x32xf32> -> vector<16x32xf32>
    %20 = arith.truncf %19 : vector<16x32xf32> to vector<16x32xbf16>
    %cst_13 = arith.constant dense<0.000000e+00> : vector<16x32xf32>
    %21 = tpu.matmul %0, %20, %cst_13 {dimension_numbers = #tpu.dot_dimension_numbers<[1], [0], [0], [1], [0, 0, 1, 1], [], []>} : vector<16x16xbf16>, vector<16x32xbf16>, vector<16x32xf32> -> vector<16x32xf32>
    %22 = vector.broadcast %1 : vector<16x1xf32> to vector<16x32xf32>
    %23 = arith.mulf %22, %21 : vector<16x32xf32>
    %c0_14 = arith.constant 0 : index
    %c0_15 = arith.constant 0 : index
    %24 = vector.load %arg6[%c0_14, %c0_15] : memref<1x32xf32, #tpu.memory_space<vmem>>, vector<1x32xf32>
    %25 = vector.broadcast %24 : vector<1x32xf32> to vector<16x32xf32>
    %26 = arith.addf %23, %25 : vector<16x32xf32>
    %27 = math.tanh %26 : vector<16x32xf32>
    %28 = vector.broadcast %1 : vector<16x1xf32> to vector<16x32xf32>
    %29 = arith.mulf %28, %27 : vector<16x32xf32>
    %c0_16 = arith.constant 0 : index
    %c0_17 = arith.constant 0 : index
    %30 = vector.load %arg7[%c0_16, %c0_17] : memref<32x32xf32, #tpu.memory_space<vmem>>, vector<32x32xf32>
    %cst_18 = arith.constant dense<0.000000e+00> : vector<16x32xf32>
    %31 = tpu.matmul %29, %30, %cst_18 {dimension_numbers = #tpu.dot_dimension_numbers<[1], [0], [0], [1], [0, 0, 1, 1], [], []>} : vector<16x32xf32>, vector<32x32xf32>, vector<16x32xf32> -> vector<16x32xf32>
    %32 = arith.truncf %31 : vector<16x32xf32> to vector<16x32xbf16>
    %cst_19 = arith.constant dense<0.000000e+00> : vector<16x32xf32>
    %33 = tpu.matmul %0, %32, %cst_19 {dimension_numbers = #tpu.dot_dimension_numbers<[1], [0], [0], [1], [0, 0, 1, 1], [], []>} : vector<16x16xbf16>, vector<16x32xbf16>, vector<16x32xf32> -> vector<16x32xf32>
    %34 = vector.broadcast %1 : vector<16x1xf32> to vector<16x32xf32>
    %35 = arith.mulf %34, %33 : vector<16x32xf32>
    %c0_20 = arith.constant 0 : index
    %c0_21 = arith.constant 0 : index
    %36 = vector.load %arg8[%c0_20, %c0_21] : memref<1x32xf32, #tpu.memory_space<vmem>>, vector<1x32xf32>
    %37 = vector.broadcast %36 : vector<1x32xf32> to vector<16x32xf32>
    %38 = arith.addf %35, %37 : vector<16x32xf32>
    %39 = math.tanh %38 : vector<16x32xf32>
    %40 = arith.truncf %39 : vector<16x32xf32> to vector<16x32xbf16>
    %c0_22 = arith.constant 0 : index
    %c0_23 = arith.constant 0 : index
    %41 = vector.load %arg9[%c0_22, %c0_23] : memref<16x32xbf16, #tpu.memory_space<vmem>>, vector<16x32xbf16>
    tpu.vector_store %arg9[%c0_22, %c0_23], %40 {strides = array<i32>} : memref<16x32xbf16, #tpu.memory_space<vmem>>, vector<16x32xbf16>,
    return
  }
}

module attributes {stable_mosaic.version = 11 : i64} {
  func.func @_pool_mlp_head_kernel(%arg0: memref<2x16xbf16, #tpu.memory_space<vmem>>, %arg1: memref<16x32xbf16, #tpu.memory_space<vmem>>, %arg2: memref<32x32xf32, #tpu.memory_space<vmem>>, %arg3: memref<1x32xf32, #tpu.memory_space<vmem>>, %arg4: memref<32x32xf32, #tpu.memory_space<vmem>>, %arg5: memref<1x32xf32, #tpu.memory_space<vmem>>, %arg6: memref<32x32xf32, #tpu.memory_space<vmem>>, %arg7: memref<1x32xf32, #tpu.memory_space<vmem>>, %arg8: memref<32x1xf32, #tpu.memory_space<vmem>>, %arg9: memref<1x1xf32, #tpu.memory_space<vmem>>, %arg10: memref<2x1xf32, #tpu.memory_space<vmem>>) attributes {dimension_semantics = [], scalar_prefetch = 0 : i64, scratch_operands = 0 : i64, tpu.core_type = #tpu.core_type<tc>} {
    %c0 = arith.constant 0 : index
    %c0_0 = arith.constant 0 : index
    %0 = vector.load %arg0[%c0, %c0_0] : memref<2x16xbf16, #tpu.memory_space<vmem>>, vector<2x16xbf16>
    %c0_1 = arith.constant 0 : index
    %c0_2 = arith.constant 0 : index
    %1 = vector.load %arg1[%c0_1, %c0_2] : memref<16x32xbf16, #tpu.memory_space<vmem>>, vector<16x32xbf16>
    %cst = arith.constant dense<0.000000e+00> : vector<2x32xf32>
    %2 = tpu.matmul %0, %1, %cst {dimension_numbers = #tpu.dot_dimension_numbers<[1], [0], [0], [1], [0, 0, 1, 1], [], []>} : vector<2x16xbf16>, vector<16x32xbf16>, vector<2x32xf32> -> vector<2x32xf32>
    %c0_3 = arith.constant 0 : index
    %c0_4 = arith.constant 0 : index
    %3 = vector.load %arg2[%c0_3, %c0_4] : memref<32x32xf32, #tpu.memory_space<vmem>>, vector<32x32xf32>
    %cst_5 = arith.constant dense<0.000000e+00> : vector<2x32xf32>
    %4 = tpu.matmul %2, %3, %cst_5 {dimension_numbers = #tpu.dot_dimension_numbers<[1], [0], [0], [1], [0, 0, 1, 1], [], []>} : vector<2x32xf32>, vector<32x32xf32>, vector<2x32xf32> -> vector<2x32xf32>
    %c0_6 = arith.constant 0 : index
    %c0_7 = arith.constant 0 : index
    %5 = vector.load %arg3[%c0_6, %c0_7] : memref<1x32xf32, #tpu.memory_space<vmem>>, vector<1x32xf32>
    %6 = vector.broadcast %5 : vector<1x32xf32> to vector<2x32xf32>
    %7 = arith.addf %4, %6 : vector<2x32xf32>
    %8 = math.tanh %7 : vector<2x32xf32>
    %c0_8 = arith.constant 0 : index
    %c0_9 = arith.constant 0 : index
    %9 = vector.load %arg4[%c0_8, %c0_9] : memref<32x32xf32, #tpu.memory_space<vmem>>, vector<32x32xf32>
    %cst_10 = arith.constant dense<0.000000e+00> : vector<2x32xf32>
    %10 = tpu.matmul %8, %9, %cst_10 {dimension_numbers = #tpu.dot_dimension_numbers<[1], [0], [0], [1], [0, 0, 1, 1], [], []>} : vector<2x32xf32>, vector<32x32xf32>, vector<2x32xf32> -> vector<2x32xf32>
    %c0_11 = arith.constant 0 : index
    %c0_12 = arith.constant 0 : index
    %11 = vector.load %arg5[%c0_11, %c0_12] : memref<1x32xf32, #tpu.memory_space<vmem>>, vector<1x32xf32>
    %12 = vector.broadcast %11 : vector<1x32xf32> to vector<2x32xf32>
    %13 = arith.addf %10, %12 : vector<2x32xf32>
    %14 = math.tanh %13 : vector<2x32xf32>
    %c0_13 = arith.constant 0 : index
    %c0_14 = arith.constant 0 : index
    %15 = vector.load %arg6[%c0_13, %c0_14] : memref<32x32xf32, #tpu.memory_space<vmem>>, vector<32x32xf32>
    %cst_15 = arith.constant dense<0.000000e+00> : vector<2x32xf32>
    %16 = tpu.matmul %14, %15, %cst_15 {dimension_numbers = #tpu.dot_dimension_numbers<[1], [0], [0], [1], [0, 0, 1, 1], [], []>} : vector<2x32xf32>, vector<32x32xf32>, vector<2x32xf32> -> vector<2x32xf32>
    %c0_16 = arith.constant 0 : index
    %c0_17 = arith.constant 0 : index
    %17 = vector.load %arg7[%c0_16, %c0_17] : memref<1x32xf32, #tpu.memory_space<vmem>>, vector<1x32xf32>
    %18 = vector.broadcast %17 : vector<1x32xf32> to vector<2x32xf32>
    %19 = arith.addf %16, %18 : vector<2x32xf32>
    %20 = math.tanh %19 : vector<2x32xf32>
    %c0_18 = arith.constant 0 : index
    %c0_19 = arith.constant 0 : index
    %21 = vector.load %arg8[%c0_18, %c0_19] : memref<32x1xf32, #tpu.memory_space<vmem>>, vector<32x1xf32>
    %cst_20 = arith.constant dense<0.000000e+00> : vector<2x1xf32>
    %22 = tpu.matmul %20, %21, %cst_20 {dimension_numbers = #tpu.dot_dimension_numbers<[1], [0], [0], [1], [0, 0, 1, 1], [], []>} : vector<2x32xf32>, vector<32x1xf32>, vector<2x1xf32> -> vector<2x1xf32>
    %c0_21 = arith.constant 0 : index
    %c0_22 = arith.constant 0 : index
    %23 = vector.load %arg9[%c0_21, %c0_22] : memref<1x1xf32, #tpu.memory_space<vmem>>, vector<1x1xf32>
    %24 = vector.broadcast %23 : vector<1x1xf32> to vector<2x1xf32>
    %25 = arith.addf %22, %24 : vector<2x1xf32>
    %c0_23 = arith.constant 0 : index
    %c0_24 = arith.constant 0 : index
    %26 = vector.load %arg10[%c0_23, %c0_24] : memref<2x1xf32, #tpu.memory_space<vmem>>, vector<2x1xf32>
    tpu.vector_store %arg10[%c0_23, %c0_24], %25 {strides = array<i32>} : memref<2x1xf32, #tpu.memory_space<vmem>>, vector<2x1xf32>,
    return
  }
}

</mosaic_0001>

<bundles_post_ra>
// kernel: gcn_forward.3
= control target key start
LH: loop header
LB: loop body
LE: loop exit
PB: predicated region body
PF: predicated region fallthrough
CT: control target
= control target key end

     0   :  { %v553_v0 = vmov 0.0   ;;  %vm554_vm0 = vmmov 0   ;;  %v555_v2 = vmov 0.0|0.0   ;;  %vm47_vm1 = vcmask 130048   ;;  %s697_s1 = inlined_call_operand.vmem [shape: bf16[16,32], index: 1, kind: input, shape index: {}]   ;;  %s698_s0 = inlined_call_operand.vmem [shape: bf16[2,16], index: 0, kind: input, shape index: {}]   ;;  %s699_s2 = inlined_call_operand.vmem [shape: f32[32,32], index: 2, kind: input, shape index: {}]   ;;  %s700_s4 = inlined_call_operand.vmem [shape: f32[32,32], index: 4, kind: input, shape index: {}]   ;;  %s701_s3 = inlined_call_operand.vmem [shape: f32[1,32], index: 3, kind: input, shape index: {}]   ;;  %s702_s6 = inlined_call_operand.vmem [shape: f32[32,32], index: 6, kind: input, shape index: {}]   ;;  %s703_s5 = inlined_call_operand.vmem [shape: f32[1,32], index: 5, kind: input, shape index: {}]   ;;  %s704_s8 = inlined_call_operand.vmem [shape: f32[32,1], index: 8, kind: input, shape index: {}]   ;;  %s705_s9 = inlined_call_operand.<no memory space> [shape: f32[1,1], index: 9, kind: input, shape index: {}]   ;;  %s706_s7 = inlined_call_operand.vmem [shape: f32[1,32], index: 7, kind: input, shape index: {}]   ;;  %s707_s10 = inlined_call_operand.vmem [shape: f32[2,1], index: 10, kind: output, shape index: {}]  }
   0x1   :  { %469 = vmatprep.subr.bf16.mxu0 %v553_v0  ;;  %v546_v1 = vld [vmem:[%s697_s1] sm:$0xff]   ;;  %471 = vmatprep.mubr.msk.bf16.mxu0 %vm554_vm0, %v553_v0  ;;  %v92_v4 = vld [vmem:[%s699_s2 + $0x8] sm:$0xff]  ;;  %v93_v7 = vld [vmem:[%s699_s2 + $0x10] sm:$0xff]  ;;  %vm102_vm2 = vcmask 261120   ;;  %v15_v42 = vstv %s705_s9  ;;  %vm431_vm3 = vcmask 1024  }
   0x2   :  { %519 = vmatprep.subr.bf16.mxu1 %v555_v2  ;;  %v91_v3 = vld [vmem:[%s699_s2] sm:$0xff]  ;;  %483 = vmatprep.mubr.msk.f32.mxu1 %vm554_vm0, %v553_v0  ;;  %v94_v8 = vld [vmem:[%s699_s2 + $0x18] sm:$0xff]  ;;  %v178_v15 = vld [vmem:[%s700_s4 + $0x8] sm:$0xff]  ;;  %16 = vst [vmem:[#allocation2] sm:$0x1] %v15_v42 }
   0x3   :  { %470 = vmatpush3.bf16.msra.mxu0 %v546_v1  ;;  %v38_v5 = vld [vmem:[%s698_s0] sm:$0x1]  ;;  %v520_v6 = vpack.c.bf16 %v92_v4, %v91_v3  ;;  %v523_v9 = vpack.c.bf16 %v94_v8, %v93_v7  ;;  %v179_v16 = vld [vmem:[%s700_s4 + $0x10] sm:$0xff]  ;;  %v180_v18 = vld [vmem:[%s700_s4 + $0x18] sm:$0xff] }
   0x4   :  { %525 = vmatprep.subr.bf16.mxu0 %v555_v2  ;;  %v177_v14 = vld [vmem:[%s700_s4] sm:$0xff]  ;;  %v529_v19 = vpack.c.bf16 %v180_v18, %v179_v16  ;;  %v263_v26 = vld [vmem:[%s702_s6 + $0x8] sm:$0xff]  ;;  %v264_v27 = vld [vmem:[%s702_s6 + $0x10] sm:$0xff] }
   0x5   :  { %521 = vmatpush3.bf16.msra.mxu1 %v520_v6  ;;  %v526_v17 = vpack.c.bf16 %v178_v15, %v177_v14  ;;  %v439_v20 = vld [vmem:[%s701_s3] ss:$0 sm:$0xff]  ;;  %v265_v29 = vld [vmem:[%s702_s6 + $0x18] sm:$0xff]  ;;  %v348_v37 = vld [vmem:[%s704_s8 + $0x8] sm:$0xff] }
   0x6   :  { %472 = vmatmul.mubr.msk.bf16.vlgmr.msra.gmra.mrb[0].mxu0 %vm47_vm1, %v38_v5  ;;  %522 = vmatprep.subr.bf16.mxu1 %v555_v2  ;;  %v262_v25 = vld [vmem:[%s702_s6] sm:$0xff]  ;;  %v535_v30 = vpack.c.bf16 %v265_v29, %v264_v27  ;;  %v349_v38 = vld [vmem:[%s704_s8 + $0x10] sm:$0xff]  ;;  %v350_v40 = vld [vmem:[%s704_s8 + $0x18] sm:$0xff] }
   0x7   :  { %494 = vmatprep.mubr.msk.f32.mxu0 %vm554_vm0, %v553_v0  ;;  %527 = vmatpush3.bf16.msra.mxu0 %v526_v17  ;;  %v532_v28 = vpack.c.bf16 %v263_v26, %v262_v25  ;;  %v441_v31 = vld [vmem:[%s703_s5] ss:$0 sm:$0xff]  ;;  %v541_v41 = vpack.c.bf16 %v350_v40, %v349_v38 }
   0x8   :  { %528 = vmatprep.subr.bf16.mxu0 %v555_v2  ;;  %v347_v36 = vld [vmem:[%s704_s8] sm:$0xff] }
   0x9   :  { %524 = vmatpush3.bf16.msra.mxu1 %v523_v9  ;;  %v538_v39 = vpack.c.bf16 %v348_v37, %v347_v36  ;;  %v443_v43 = vld [vmem:[%s706_s7] ss:$0 sm:$0xff] }
   0xa   :  { %531 = vmatprep.subr.bf16.mxu1 %v555_v2  ;;  %v445_v48 = vld [vmem:[#allocation2] ss:$0 sm:$0xff] }
   0xb   :  { %530 = vmatpush3.bf16.msra.mxu0 %v529_v19 }
   0xc   :  { %537 = vmatprep.subr.bf16.mxu0 %v555_v2 }
  0xd9   :  { %v85_v10 = vpop.f32.mrb[0].mxu0 }
  0xda   :  { %v473_v11 = vpop.f32.mrb[1].mxu0  ;;  %484 = vmatmul.mubr.msk.f32.vlgmr.msra.gmra.mrb[0].mxu1 %vm102_vm2, %v85_v10 }
  0xdb   :  { %v88_v12 = vpop.f32.mrb[2].mxu0  ;;  %505 = vmatprep.mubr.msk.f32.mxu1 %vm554_vm0, %v553_v0  ;;  %533 = vmatpush3.bf16.msra.mxu1 %v532_v28 }
  0xdc   :  { %v474_v13 = vpop.f32.mrb[3].mxu0  ;;  %534 = vmatprep.subr.bf16.mxu1 %v555_v2 }
  0xdf   :  { %536 = vmatpush3.bf16.msra.mxu1 %v535_v30 }
 0x1ad   :  { %v172_v21 = vpop.f32.mrb[0].mxu1 }
 0x1ae   :  { %v173_v22 = vadd.f32 %v439_v20, %v172_v21  ;;  %v485_v23 = vpop.f32.mrb[1].mxu1 }
 0x1b0   :  { %547 = vtanh.f32 %v173_v22 }
 0x1ba   :  { %v548_v24 = vpop.eup %547 }
 0x1bb   :  { %495 = vmatmul.mubr.msk.f32.vlgmr.msra.gmra.mrb[4].mxu0 %vm102_vm2, %v548_v24 }
 0x1bc   :  { %516 = vmatprep.mubr.msk.f32.mxu0 %vm554_vm0, %v553_v0  ;;  %539 = vmatpush3.bf16.msra.mxu0 %v538_v39 }
 0x1bd   :  { %540 = vmatprep.subr.bf16.mxu0 %v555_v2 }
 0x1c0   :  { %542 = vmatpush3.bf16.msra.mxu0 %v541_v41 }
 0x28e   :  { %v257_v32 = vpop.f32.mrb[4].mxu0 }
 0x28f   :  { %v258_v33 = vadd.f32 %v441_v31, %v257_v32  ;;  %v496_v34 = vpop.f32.mrb[5].mxu0 }
 0x291   :  { %549 = vtanh.f32 %v258_v33 }
 0x29b   :  { %v550_v35 = vpop.eup %549 }
 0x29c   :  { %506 = vmatmul.mubr.msk.f32.vlgmr.msra.gmra.mrb[2].mxu1 %vm102_vm2, %v550_v35 }
 0x36f   :  { %v342_v44 = vpop.f32.mrb[2].mxu1 }
 0x370   :  { %v343_v45 = vadd.f32 %v443_v43, %v342_v44  ;;  %v507_v46 = vpop.f32.mrb[3].mxu1 }
 0x372   :  { %551 = vtanh.f32 %v343_v45 }
 0x37c   :  { %v552_v47 = vpop.eup %551 }
 0x37d   :  { %517 = vmatmul.mubr.msk.f32.vlgmr.msra.gmra.mrb[6].mxu0 %vm102_vm2, %v552_v47 }
 0x450   :  { %v427_v49 = vpop.f32.mrb[6].mxu0 }
 0x451   :  { %v428_v50 = vadd.f32 %v445_v48, %v427_v49  ;;  %v518_v51 = vpop.f32.mrb[7].mxu0 }
 0x453   :  { %432 = vst.msk [vmem:[%s707_s10] sm:$0x3] %vm431_vm3, %v428_v50 }

// kernel: gcn_forward.2
= control target key start
LH: loop header
LB: loop body
LE: loop exit
PB: predicated region body
PF: predicated region fallthrough
CT: control target
= control target key end

     0   :  { %v620_v0 = vmov 0   ;;  %vm54_vm0 = vcmask 64512   ;;  %v621_v11 = vmov 0.0   ;;  %vm622_vm1 = vmmov 0   ;;  %s758_s1 = inlined_call_operand.vmem [shape: f32[16,1], index: 1, kind: input, shape index: {}]   ;;  %s759_s3 = inlined_call_operand.vmem [shape: f32[8,32], index: 3, kind: input, shape index: {}]   ;;  %s760_s2 = inlined_call_operand.vmem [shape: bf16[16,8], index: 2, kind: input, shape index: {}]   ;;  %s761_s0 = inlined_call_operand.vmem [shape: bf16[16,16], index: 0, kind: input, shape index: {}]   ;;  %s762_s5 = inlined_call_operand.vmem [shape: f32[32,32], index: 5, kind: input, shape index: {}]   ;;  %s763_s4 = inlined_call_operand.vmem [shape: f32[1,32], index: 4, kind: input, shape index: {}]   ;;  %s764_s7 = inlined_call_operand.vmem [shape: f32[32,32], index: 7, kind: input, shape index: {}]   ;;  %s765_s6 = inlined_call_operand.vmem [shape: f32[1,32], index: 6, kind: input, shape index: {}]   ;;  %s766_s8 = inlined_call_operand.vmem [shape: f32[1,32], index: 8, kind: input, shape index: {}]   ;;  %s767_s9 = inlined_call_operand.vmem [shape: bf16[16,32], index: 9, kind: output, shape index: {}]  }
   0x1   :  { %606 = vset.pattern.permute.xlu0 %v620_v0  ;;  %v35_v1 = vld [vmem:[%s758_s1] sm:$0xff]  ;;  %v36_v2 = vld [vmem:[%s758_s1 + $0x8] sm:$0xff]  ;;  %547 = vmatprep.subr.bf16.mxu0 %v621_v11  ;;  %vm142_vm2 = vcmask 130048   ;;  %v204_v18 = vld [vmem:[%s762_s5 + $0x10] sm:$0xff]  ;;  %vm206_vm3 = vcmask 261120   ;;  %vm493_vm4 = vcmask 257024  }
   0x2   :  { %43 = vperm.xlu0 %606, %v35_v1   ;;  %v53_v3 = vld [vmem:[%s759_s3] sm:$0xff]  ;;  %549 = vmatprep.mubr.msk.bf16.mxu0 %vm622_vm1, %v621_v11  ;;  %v203_v17 = vld [vmem:[%s762_s5 + $0x8] sm:$0xff]  ;;  %v205_v20 = vld [vmem:[%s762_s5 + $0x18] sm:$0xff] }
   0x3   :  { %542 = vmatprep.subr.mxu1 %v53_v3  ;;  %v518_v4 = vld [vmem:[%s760_s2] sm:$0xff]   ;;  %v591_v21 = vpack.c.bf16 %v205_v20, %v204_v18  ;;  %v346_v39 = vld [vmem:[%s764_s7 + $0x8] sm:$0xff]  ;;  %v347_v40 = vld [vmem:[%s764_s7 + $0x10] sm:$0xff] }
   0x4   :  { %543 = vmatpush3.msra.mxu1 %v53_v3  ;;  %v519_v5 = vunpack.c.l.bf16 %v518_v4  ;;  %v520_v7 = vunpack.c.h.bf16 %v518_v4  ;;  %v696_v15 = vld [vmem:[%s761_s0] sm:$0xff]   ;;  %v348_v42 = vld [vmem:[%s764_s7 + $0x18] sm:$0xff] }
   0x5   :  { %564 = vmatprep.subr.bf16.mxu1 %v621_v11  ;;  %v202_v16 = vld [vmem:[%s762_s5] sm:$0xff]  ;;  %v599_v43 = vpack.c.bf16 %v348_v42, %v347_v40 }
   0x6   :  { %48 = vperm.xlu0 %606, %v36_v2   ;;  %v587_v19 = vpack.c.bf16 %v203_v17, %v202_v16  ;;  %v504_v23 = vld [vmem:[%s763_s4] ss:$0 sm:$0xff] }
   0x7   :  { %v345_v38 = vld [vmem:[%s764_s7] sm:$0xff] }
   0x8   :  { %v595_v41 = vpack.c.bf16 %v346_v39, %v345_v38  ;;  %v508_v45 = vld [vmem:[%s765_s6] ss:$0 sm:$0xff] }
   0x9   :  { %v512_v61 = vld [vmem:[%s766_s8] ss:$0 sm:$0xff] }
  0x81   :  { %v685_v6 = vpop.permute.xlu0 %43 }
  0x82   :  { %v51_v8 = vmul.f32 %v519_v5, %v685_v6 }
  0x84   :  { %544 = vmatprep.mubr.msk.f32.mxu1 %vm54_vm0, %v51_v8 }
  0x85   :  { %v688_v9 = vpop.permute.xlu0 %48 }
  0x86   :  { %v52_v10 = vmul.f32 %v520_v7, %v688_v9 }
  0x88   :  { %545 = vmatmul.mubr.msk.f32.vlgmr.msra.gmra.mrb[0].mxu1 %vm54_vm0, %v52_v10 }
  0x89   :  { %566 = vmatprep.mubr.msk.bf16.mxu1 %vm622_vm1, %v621_v11 }
 0x15b   :  { %v546_v12 = vpop.f32.mrb[0].mxu1 }
 0x15c   :  { %v127_v13 = vpop.f32.mrb[1].mxu1 }
 0x15d   :  { %v136_v14 = vpack.c.bf16 %v546_v12, %v127_v13 }
 0x15f   :  { %548 = vmatpush3.bf16.msra.mxu0 %v136_v14 }
 0x160   :  { %588 = vmatprep.subr.bf16.mxu0 %v587_v19 }
 0x162   :  { %550 = vmatmul.mubr.msk.bf16.vlgmr.msra.gmra.mrb[0].mxu0 %vm142_vm2, %v696_v15 }
 0x163   :  { %590 = vmatpush3.bf16.msra.mxu0 %v587_v19 }
 0x164   :  { %592 = vmatprep.subr.bf16.mxu0 %v591_v21 }
 0x167   :  { %594 = vmatpush3.bf16.msra.mxu0 %v591_v21 }
 0x168   :  { %596 = vmatprep.subr.bf16.mxu0 %v595_v41 }
 0x235   :  { %v180_v22 = vpop.f32.mrb[0].mxu0 }
 0x236   :  { %v187_v24 = vmul.f32 %v180_v22, %v685_v6  ;;  %v551_v25 = vpop.f32.mrb[1].mxu0 }
 0x237   :  { %v183_v26 = vpop.f32.mrb[2].mxu0 }
 0x238   :  { %v196_v27 = vadd.f32 %v504_v23, %v187_v24  ;;  %v188_v28 = vmul.f32 %v183_v26, %v688_v9  ;;  %v552_v29 = vpop.f32.mrb[3].mxu0 }
 0x23a   :  { %608 = vtanh.f32 %v196_v27  ;;  %v197_v30 = vadd.f32 %v504_v23, %v188_v28 }
 0x23c   :  { %610 = vtanh.f32 %v197_v30 }
 0x244   :  { %v609_v31 = vpop.eup %608 }
 0x245   :  { %v200_v32 = vmul.f32 %v609_v31, %v685_v6 }
 0x246   :  { %v611_v33 = vpop.eup %610 }
 0x247   :  { %561 = vmatprep.mubr.msk.f32.mxu0 %vm206_vm3, %v200_v32  ;;  %v201_v34 = vmul.f32 %v611_v33, %v688_v9 }
 0x249   :  { %562 = vmatmul.mubr.msk.f32.vlgmr.msra.gmra.mrb[4].mxu0 %vm206_vm3, %v201_v34 }
 0x24a   :  { %598 = vmatpush3.bf16.msra.mxu0 %v595_v41 }
 0x24b   :  { %600 = vmatprep.subr.bf16.mxu0 %v599_v43 }
 0x24e   :  { %602 = vmatpush3.bf16.msra.mxu0 %v599_v43 }
 0x31c   :  { %v563_v35 = vpop.f32.mrb[4].mxu0 }
 0x31d   :  { %v279_v36 = vpop.f32.mrb[5].mxu0 }
 0x31e   :  { %v288_v37 = vpack.c.bf16 %v563_v35, %v279_v36 }
 0x320   :  { %565 = vmatpush3.bf16.msra.mxu1 %v288_v37 }
 0x321   :  { %581 = vmatprep.subr.bf16.mxu1 %v621_v11 }
 0x323   :  { %567 = vmatmul.mubr.msk.bf16.vlgmr.msra.gmra.mrb[4].mxu1 %vm142_vm2, %v696_v15 }
 0x324   :  { %583 = vmatprep.mubr.msk.bf16.mxu1 %vm622_vm1, %v621_v11 }
 0x3f6   :  { %v323_v44 = vpop.f32.mrb[4].mxu1 }
 0x3f7   :  { %v330_v46 = vmul.f32 %v323_v44, %v685_v6  ;;  %v568_v47 = vpop.f32.mrb[5].mxu1 }
 0x3f8   :  { %v326_v48 = vpop.f32.mrb[6].mxu1 }
 0x3f9   :  { %v339_v49 = vadd.f32 %v508_v45, %v330_v46  ;;  %v331_v50 = vmul.f32 %v326_v48, %v688_v9  ;;  %v569_v51 = vpop.f32.mrb[7].mxu1 }
 0x3fb   :  { %612 = vtanh.f32 %v339_v49  ;;  %v340_v52 = vadd.f32 %v508_v45, %v331_v50 }
 0x3fd   :  { %614 = vtanh.f32 %v340_v52 }
 0x405   :  { %v613_v53 = vpop.eup %612 }
 0x406   :  { %v343_v54 = vmul.f32 %v613_v53, %v685_v6 }
 0x407   :  { %v615_v55 = vpop.eup %614 }
 0x408   :  { %578 = vmatprep.mubr.msk.f32.mxu0 %vm206_vm3, %v343_v54  ;;  %v344_v56 = vmul.f32 %v615_v55, %v688_v9 }
 0x40a   :  { %579 = vmatmul.mubr.msk.f32.vlgmr.msra.gmra.mrb[6].mxu0 %vm206_vm3, %v344_v56 }
 0x4dd   :  { %v580_v57 = vpop.f32.mrb[6].mxu0 }
 0x4de   :  { %v421_v58 = vpop.f32.mrb[7].mxu0 }
 0x4df   :  { %v430_v59 = vpack.c.bf16 %v580_v57, %v421_v58 }
 0x4e1   :  { %582 = vmatpush3.bf16.msra.mxu1 %v430_v59 }
 0x4e4   :  { %584 = vmatmul.mubr.msk.bf16.vlgmr.msra.gmra.mrb[8].mxu1 %vm142_vm2, %v696_v15 }
 0x5b7   :  { %v465_v60 = vpop.f32.mrb[8].mxu1 }
 0x5b8   :  { %v472_v62 = vmul.f32 %v465_v60, %v685_v6  ;;  %v585_v63 = vpop.f32.mrb[9].mxu1 }
 0x5b9   :  { %v468_v0 = vpop.f32.mrb[10].mxu1 }
 0x5ba   :  { %v481_v1 = vadd.f32 %v512_v61, %v472_v62  ;;  %v473_v2 = vmul.f32 %v468_v0, %v688_v9  ;;  %v586_v3 = vpop.f32.mrb[11].mxu1 }
 0x5bc   :  { %616 = vtanh.f32 %v481_v1  ;;  %v482_v4 = vadd.f32 %v512_v61, %v473_v2 }
 0x5be   :  { %618 = vtanh.f32 %v482_v4 }
 0x5c6   :  { %v617_v5 = vpop.eup %616 }
 0x5c7   :  { %v515_v7 = vpack.c.bf16 %v617_v5, %v617_v5 }
 0x5c8   :  { %v619_v8 = vpop.eup %618 }
 0x5c9   :  { %494 = vst.msk [vmem:[%s767_s9] sm:$0xf] %vm493_vm4, %v515_v7  ;;  %v516_v10 = vpack.c.bf16 %v619_v8, %v619_v8 }
 0x5cb   :  { %495 = vst.msk [vmem:[%s767_s9 + $0x4] sm:$0xf] %vm493_vm4, %v516_v10 }

</bundles_post_ra>
